<compile_context>
chip_gen: v6e
topology: v6e:2x2x1
jax: 0.10.0
libtpu: 0.0.40
codegen_flags: <defaults>
</compile_context>

<pallas_src>
import functools
import math

import numpy as np

import jax
import jax.numpy as jnp
from jax import lax
from jax.experimental import pallas as pl
from jax.experimental.pallas import tpu as pltpu


def _round_up(x, m):
    return (x + m - 1) // m * m


def _vmem_capacity_bytes():
    """Per-core VMEM capacity; conservative 64 MiB (v7x) if unavailable."""
    try:
        info = pltpu.get_tpu_info()
        for attr in ("vmem_capacity_bytes", "vmem_size_bytes", "vmem_bytes"):
            cap = getattr(info, attr, None)
            if cap and int(cap) >= (16 << 20):
                return int(cap)
    except Exception:
        pass
    return 64 << 20


def _smha_kernel(x_q_ref, x_k_ref, wq_ref, wk_ref, bias_ref, o_ref, k_scratch,
                 *, heads_per_group, d_k, lk, tq, compute_dtype, exp_dtype,
                 bias_is_resident):
    # x_q_ref   : (1, tq, d_model)        q-tile activations of this batch
    # x_k_ref   : (1, Lk_pad, d_model)    full (padded) K activations of batch
    # wq_ref    : (1, d_model, Hg*d_k)    this head group; 1/sqrt(d_k) folded in
    # wk_ref    : (1, d_model, Hg*d_k)
    # bias_ref  : resident: (Lq_grid, Lk_pad) whole bias; else (tq, Lk_pad) tile
    # o_ref     : (1, Hg, tq, Lk)         unpadded Lk -> no padded writeback
    # k_scratch : (Lk_pad, Hg*d_k)        projected K of this (batch, group)
    qi = pl.program_id(2)

    # Project K for all heads of this group ONCE per (batch, group).  The
    # q-tile axis is the innermost ("arbitrary") axis, so the scratch carries
    # across q tiles and the x_k block (index constant in qi) is not re-DMA'd.
    @pl.when(qi == 0)
    def _():
        x_k = x_k_ref[0].astype(compute_dtype)
        wk = wk_ref[0].astype(compute_dtype)
        k_scratch[...] = jnp.dot(
            x_k, wk, preferred_element_type=jnp.float32).astype(k_scratch.dtype)

    # Wide Q projection: one matmul with MXU N = Hg*d_k (not d_k).
    x_q = x_q_ref[0].astype(compute_dtype)
    wq = wq_ref[0].astype(compute_dtype)          # scale already folded in
    q_all = jnp.dot(x_q, wq, preferred_element_type=jnp.float32)

    if bias_is_resident:
        # Whole bias lives in VMEM (read from HBM exactly once); slice the
        # current q-tile rows.  tq is a multiple of 8 whenever qi can be > 0.
        row0 = qi * tq
        if tq % 8 == 0:
            row0 = pl.multiple_of(row0, 8)
        bias = bias_ref[pl.ds(row0, tq), :].astype(jnp.float32)
    else:
        bias = bias_ref[...].astype(jnp.float32)

    exp_in_f32 = np.dtype(exp_dtype) == np.dtype(jnp.float32)

    # Small static head count -> unrolled loop.
    for h in range(heads_per_group):
        q_h = q_all[:, h * d_k:(h + 1) * d_k].astype(compute_dtype)
        # Read per-head K directly from the scratch ref (no full k_all live).
        k_h = k_scratch[:, h * d_k:(h + 1) * d_k]              # (Lk_pad, d_k)
        # Contract d_k on both operands: no K^T materialized.
        scores = lax.dot_general(q_h, k_h, (((1,), (1,)), ((), ())),
                                 preferred_element_type=jnp.float32)
        scores = scores + bias                                  # additive bias

        # Numerically stable softmax over the lane axis.
        m = jnp.max(scores, axis=-1, keepdims=True)
        s = scores - m
        if exp_in_f32:
            e = jnp.exp(s)
        else:
            # bf16 exp: EUP throughput ~2x f32 on v6e/v7x; sums stay f32.
            e = jnp.exp(s.astype(exp_dtype)).astype(jnp.float32)
        denom = jnp.sum(e, axis=-1, keepdims=True)
        attn = e * pl.reciprocal(denom, approx=True)

        # Drop padded key columns at the store: no padded-column writeback and
        # no post-kernel slice copy (output last dim is the true Lk).
        o_ref[0, h] = attn[:, :lk].astype(o_ref.dtype)


def smha_forward(input_Q, input_K, input_V, W_Q, W_K, *, n_heads, d_k,
                 compute_dtype=jnp.bfloat16, out_dtype=jnp.bfloat16,
                 exp_dtype=None, head_groups=None, tq_max=512,
                 vmem_budget_frac=0.65):
    """input_Q/input_K: [B, L, d_model]; input_V: [Lq, Lk] additive score bias
    (DSTAGNN usage); W_Q/W_K: torch-style Linear weights [n_heads*d_k, d_model].
    Returns softmax(Q K^T / sqrt(d_k) + input_V): [B, n_heads, Lq, Lk]."""
    B, Lq, d_model = input_Q.shape
    _, Lk, _ = input_K.shape
    compute_dtype = np.dtype(compute_dtype)
    out_dtype = np.dtype(out_dtype)
    exp_dtype = np.dtype(compute_dtype if exp_dtype is None else exp_dtype)

    # Head-group grid axis: second "parallel" axis so both TensorCores get work
    # when the batch alone cannot balance them (e.g. B == 1 or odd on v7x).
    if head_groups is None:
        head_groups = 2 if (B % 2 == 1 and n_heads % 2 == 0) else 1
    assert n_heads % head_groups == 0, "head_groups must divide n_heads"
    G = head_groups
    Hg = n_heads // G
    hdk_g = Hg * d_k

    Lk_pad = _round_up(Lk, 128)

    # Bias storage dtype: bf16 on the bf16 path halves its HBM/VMEM footprint;
    # keep f32 bias on the f32 path to preserve tight accuracy.
    bias_dtype = (np.dtype(jnp.bfloat16)
                  if compute_dtype == np.dtype(jnp.bfloat16)
                  else np.dtype(jnp.float32))
    cbytes, obytes, bbytes = (compute_dtype.itemsize, out_dtype.itemsize,
                              bias_dtype.itemsize)

    # --- VMEM-capacity-derived tiling (v5e/v6e: 128 MiB, v7x: 64 MiB) --------
    cap = _vmem_capacity_bytes()
    budget = int(cap * vmem_budget_frac)     # headroom for compiler scratch

    # Keep the whole bias resident in VMEM (DMA'd once, not once per batch)?
    bias_rows8 = _round_up(max(Lq, 8), 8)
    bias_resident = (2 * bias_rows8 * Lk_pad * bbytes
                     <= min(budget // 4, 16 << 20))

    def vmem_estimate(tq_rows):
        nq = -(-Lq // max(tq_rows, 1))
        fixed = (2 * Lk_pad * d_model * 4            # x_k (double-buffered f32)
                 + 2 * 2 * d_model * hdk_g * 4       # wq + wk (double-buffered)
                 + Lk_pad * hdk_g * cbytes)          # K-projection scratch
        if bias_resident:
            fixed += 2 * nq * tq_rows * Lk_pad * bbytes
        per_row = (2 * d_model * 4                   # x_q (double-buffered)
                   + 2 * Hg * Lk * obytes            # output tile (double-buf)
                   + 4 * Lk_pad * 4                  # f32 scores/e intermediates
                   + hdk_g * 4)                      # q_all
        if not bias_resident:
            per_row += 2 * Lk_pad * bbytes
        return fixed + tq_rows * per_row

    single_tile = (Lq <= tq_max) and (vmem_estimate(_round_up(Lq, 8)) <= budget)
    if single_tile:
        tq = Lq                                       # no Lq padding at all
        num_q_tiles = 1
    else:
        tq = max(8, min(_round_up(Lq, 8), _round_up(tq_max, 8)))
        while tq > 8 and vmem_estimate(tq) > budget:
            tq -= 8
        num_q_tiles = -(-Lq // tq)
    Lq_grid = num_q_tiles * tq                        # == Lq when divisible

    vmem_limit = min(int(cap * 0.9),
                     max(int(cap * 0.8), vmem_estimate(tq) + (8 << 20)))

    # --- Host-side operand prep ----------------------------------------------
    scale = 1.0 / math.sqrt(d_k)
    # (G, d_model, Hg*d_k): head group g owns heads [g*Hg, (g+1)*Hg).
    wq_all = jnp.transpose((W_Q.T * scale).astype(jnp.float32)
                           .reshape(d_model, G, hdk_g), (1, 0, 2))
    wk_all = jnp.transpose(W_K.T.astype(jnp.float32)
                           .reshape(d_model, G, hdk_g), (1, 0, 2))

    x_q = input_Q
    if Lq_grid != Lq:                                  # rare multi-tile fallback
        x_q = jnp.pad(input_Q, ((0, 0), (0, Lq_grid - Lq), (0, 0)))
    x_k = input_K
    if Lk_pad != Lk:
        x_k = jnp.pad(input_K, ((0, 0), (0, Lk_pad - Lk), (0, 0)))

    bias = jnp.pad(input_V.astype(jnp.float32),
                   ((0, Lq_grid - Lq), (0, Lk_pad - Lk)))
    if Lk_pad != Lk:
        col_pad = (jnp.arange(Lk_pad) >= Lk)[None, :]
        bias = jnp.where(col_pad, jnp.float32(-1e30), bias)   # ~0 attention
    bias = bias.astype(bias_dtype)

    if bias_resident:
        bias_spec = pl.BlockSpec((Lq_grid, Lk_pad), lambda b, g, qi: (0, 0))
    else:
        bias_spec = pl.BlockSpec((tq, Lk_pad), lambda b, g, qi: (qi, 0))

    kernel = functools.partial(
        _smha_kernel, heads_per_group=Hg, d_k=d_k, lk=Lk, tq=tq,
        compute_dtype=compute_dtype, exp_dtype=exp_dtype,
        bias_is_resident=bias_resident)

    out = pl.pallas_call(
        kernel,
        out_shape=jax.ShapeDtypeStruct((B, n_heads, Lq_grid, Lk), out_dtype),
        grid_spec=pltpu.PrefetchScalarGridSpec(
            num_scalar_prefetch=0,
            grid=(B, G, num_q_tiles),
            in_specs=[
                pl.BlockSpec((1, tq, d_model), lambda b, g, qi: (b, qi, 0)),
                pl.BlockSpec((1, Lk_pad, d_model), lambda b, g, qi: (b, 0, 0)),
                pl.BlockSpec((1, d_model, hdk_g), lambda b, g, qi: (g, 0, 0)),
                pl.BlockSpec((1, d_model, hdk_g), lambda b, g, qi: (g, 0, 0)),
                bias_spec,
            ],
            out_specs=pl.BlockSpec((1, Hg, tq, Lk),
                                   lambda b, g, qi: (b, g, qi, 0)),
            scratch_shapes=[pltpu.VMEM((Lk_pad, hdk_g), compute_dtype)],
        ),
        compiler_params=pltpu.CompilerParams(
            dimension_semantics=("parallel", "parallel", "arbitrary"),
            vmem_limit_bytes=int(vmem_limit),
        ),
    )(x_q, x_k, wq_all, wk_all, bias)

    if Lq_grid != Lq:
        out = out[:, :, :Lq, :]
    return out


def smha_reference(input_Q, input_K, input_V, W_Q, W_K, *, n_heads, d_k):
    B, Lq, _ = input_Q.shape
    Q = (input_Q @ W_Q.T).reshape(B, Lq, n_heads, d_k).transpose(0, 2, 1, 3)
    K = (input_K @ W_K.T).reshape(B, -1, n_heads, d_k).transpose(0, 2, 1, 3)
    scores = jnp.einsum("bhqd,bhkd->bhqk", Q, K) / math.sqrt(d_k)
    return jax.nn.softmax(scores + input_V, axis=3)


if __name__ == "__main__":
    # Small shapes consistent with the module's forward.
    B, L, d_model, d_k, n_heads = 2, 8, 32, 16, 4

    key = jax.random.PRNGKey(0)
    kq, kk, kv, kwq, kwk = jax.random.split(key, 5)

    input_Q = jax.random.normal(kq, (B, L, d_model), dtype=jnp.float32)
    input_K = jax.random.normal(kk, (B, L, d_model), dtype=jnp.float32)
    input_V = jax.random.normal(kv, (L, L), dtype=jnp.float32)  # additive bias

    bound = 1.0 / math.sqrt(d_model)
    W_Q = jax.random.uniform(kwq, (n_heads * d_k, d_model),
                             minval=-bound, maxval=bound, dtype=jnp.float32)
    W_K = jax.random.uniform(kwk, (n_heads * d_k, d_model),
                             minval=-bound, maxval=bound, dtype=jnp.float32)

    ref = smha_reference(input_Q, input_K, input_V, W_Q, W_K,
                         n_heads=n_heads, d_k=d_k)

    # 1) f32 end-to-end: tight check.
    out_f32 = smha_forward(input_Q, input_K, input_V, W_Q, W_K,
                           n_heads=n_heads, d_k=d_k,
                           compute_dtype=jnp.float32, out_dtype=jnp.float32)
    out_f32 = jax.block_until_ready(out_f32)
    assert out_f32.shape == (B, n_heads, L, L)
    err = float(jnp.max(jnp.abs(out_f32 - ref)))
    assert err < 2e-3, f"f32 path max err {err}"

    # 2) Default bf16 path (recommended for v5e/v6e/v7x): loose check.
    out_bf16 = smha_forward(input_Q, input_K, input_V, W_Q, W_K,
                            n_heads=n_heads, d_k=d_k)
    out_bf16 = jax.block_until_ready(out_bf16)
    assert out_bf16.shape == (B, n_heads, L, L)
    err = float(jnp.max(jnp.abs(out_bf16.astype(jnp.float32) - ref)))
    assert err < 3e-2, f"bf16 path max err {err}"

    # 3) Odd batch (B=1): auto head-group axis -> both TensorCores get work.
    ref1 = smha_reference(input_Q[:1], input_K[:1], input_V, W_Q, W_K,
                          n_heads=n_heads, d_k=d_k)
    out1 = smha_forward(input_Q[:1], input_K[:1], input_V, W_Q, W_K,
                        n_heads=n_heads, d_k=d_k,
                        compute_dtype=jnp.float32, out_dtype=jnp.float32)
    out1 = jax.block_until_ready(out1)
    err = float(jnp.max(jnp.abs(out1 - ref1)))
    assert err < 2e-3, f"head-group path max err {err}"

    # 4) Multi-q-tile path (small forced tq_max): exercises the per-batch
    #    K-projection carry, the dynamic bias slice and the Lq fallback.
    L2 = 36
    kq2, kk2, kv2 = jax.random.split(jax.random.PRNGKey(1), 3)
    iQ2 = jax.random.normal(kq2, (B, L2, d_model), dtype=jnp.float32)
    iK2 = jax.random.normal(kk2, (B, L2, d_model), dtype=jnp.float32)
    iV2 = jax.random.normal(kv2, (L2, L2), dtype=jnp.float32)
    ref2 = smha_reference(iQ2, iK2, iV2, W_Q, W_K, n_heads=n_heads, d_k=d_k)
    out2 = smha_forward(iQ2, iK2, iV2, W_Q, W_K, n_heads=n_heads, d_k=d_k,
                        compute_dtype=jnp.float32, out_dtype=jnp.float32,
                        tq_max=16)
    out2 = jax.block_until_ready(out2)
    assert out2.shape == (B, n_heads, L2, L2)
    err = float(jnp.max(jnp.abs(out2 - ref2)))
    assert err < 2e-3, f"multi-tile path max err {err}"

    print("KERNEL_OK")
</pallas_src>

<mosaic_0001>
module attributes {stable_mosaic.version = 11 : i64} {
  func.func @_smha_kernel(%arg0: i32, %arg1: i32, %arg2: i32, %arg3: memref<1x8x32xf32, #tpu.memory_space<vmem>>, %arg4: memref<1x128x32xf32, #tpu.memory_space<vmem>>, %arg5: memref<1x32x64xf32, #tpu.memory_space<vmem>>, %arg6: memref<1x32x64xf32, #tpu.memory_space<vmem>>, %arg7: memref<8x128xf32, #tpu.memory_space<vmem>>, %arg8: memref<1x4x8x8xf32, #tpu.memory_space<vmem>>, %arg9: memref<128x64xf32, #tpu.memory_space<vmem>>) attributes {dimension_semantics = [#tpu.dimension_semantics<parallel>, #tpu.dimension_semantics<parallel>, #tpu.dimension_semantics<arbitrary>], iteration_bounds = array<i64: 2, 1, 1>, scalar_prefetch = 0 : i64, scratch_operands = 1 : i64, tpu.core_type = #tpu.core_type<tc>, window_params = [{transform_indices = @transform_0, window_bounds = array<i64: 1, 8, 32>}, {transform_indices = @transform_1, window_bounds = array<i64: 1, 128, 32>}, {transform_indices = @transform_2, window_bounds = array<i64: 1, 32, 64>}, {transform_indices = @transform_3, window_bounds = array<i64: 1, 32, 64>}, {pipeline_mode = #tpu.pipeline_mode<synchronous>, transform_indices = @transform_4, window_bounds = array<i64: 8, 128>}, {transform_indices = @transform_5, window_bounds = array<i64: 1, 4, 8, 8>}]} {
    %c0_i32 = arith.constant 0 : i32
    %0 = arith.cmpi eq, %arg2, %c0_i32 : i32
    %1 = arith.extui %0 : i1 to i32
    %c0_i32_0 = arith.constant 0 : i32
    %2 = arith.cmpi ne, %1, %c0_i32_0 : i32
    scf.if %2 {
      %c0_37 = arith.constant 0 : index
      %c0_38 = arith.constant 0 : index
      %c0_39 = arith.constant 0 : index
      %84 = vector.load %arg4[%c0_37, %c0_38, %c0_39] : memref<1x128x32xf32, #tpu.memory_space<vmem>>, vector<1x128x32xf32>
      %85 = vector.shape_cast %84 : vector<1x128x32xf32> to vector<128x32xf32>
      %c0_40 = arith.constant 0 : index
      %c0_41 = arith.constant 0 : index
      %c0_42 = arith.constant 0 : index
      %86 = vector.load %arg6[%c0_40, %c0_41, %c0_42] : memref<1x32x64xf32, #tpu.memory_space<vmem>>, vector<1x32x64xf32>
      %87 = vector.shape_cast %86 : vector<1x32x64xf32> to vector<32x64xf32>
      %cst_43 = arith.constant dense<0.000000e+00> : vector<128x64xf32>
      %88 = tpu.matmul %85, %87, %cst_43 {dimension_numbers = #tpu.dot_dimension_numbers<[1], [0], [0], [1], [0, 0, 1, 1], [], []>} : vector<128x32xf32>, vector<32x64xf32>, vector<128x64xf32> -> vector<128x64xf32>
      %c0_44 = arith.constant 0 : index
      %c0_45 = arith.constant 0 : index
      %89 = vector.load %arg9[%c0_44, %c0_45] : memref<128x64xf32, #tpu.memory_space<vmem>>, vector<128x64xf32>
      tpu.vector_store %arg9[%c0_44, %c0_45], %88 {strides = array<i32>} : memref<128x64xf32, #tpu.memory_space<vmem>>, vector<128x64xf32>,
    } else {
    }
    %c0 = arith.constant 0 : index
    %c0_1 = arith.constant 0 : index
    %c0_2 = arith.constant 0 : index
    %3 = vector.load %arg3[%c0, %c0_1, %c0_2] : memref<1x8x32xf32, #tpu.memory_space<vmem>>, vector<1x8x32xf32>
    %4 = vector.shape_cast %3 : vector<1x8x32xf32> to vector<8x32xf32>
    %c0_3 = arith.constant 0 : index
    %c0_4 = arith.constant 0 : index
    %c0_5 = arith.constant 0 : index
    %5 = vector.load %arg5[%c0_3, %c0_4, %c0_5] : memref<1x32x64xf32, #tpu.memory_space<vmem>>, vector<1x32x64xf32>
    %6 = vector.shape_cast %5 : vector<1x32x64xf32> to vector<32x64xf32>
    %cst = arith.constant dense<0.000000e+00> : vector<8x64xf32>
    %7 = tpu.matmul %4, %6, %cst {dimension_numbers = #tpu.dot_dimension_numbers<[1], [0], [0], [1], [0, 0, 1, 1], [], []>} : vector<8x32xf32>, vector<32x64xf32>, vector<8x64xf32> -> vector<8x64xf32>
    %c8_i32 = arith.constant 8 : i32
    %8 = arith.muli %arg2, %c8_i32 : i32
    %9 = tpu.assume_multiple %8, 8 : i32
    %10 = arith.index_cast %9 : i32 to index
    %c0_6 = arith.constant 0 : index
    %11 = vector.load %arg7[%10, %c0_6] : memref<8x128xf32, #tpu.memory_space<vmem>>, vector<8x128xf32>
    %12 = vector.extract_strided_slice %7 {offsets = [0, 0], sizes = [8, 16], strides = [1, 1]} : vector<8x64xf32> to vector<8x16xf32>
    %c0_7 = arith.constant 0 : index
    %c0_8 = arith.constant 0 : index
    %13 = vector.load %arg9[%c0_7, %c0_8] : memref<128x64xf32, #tpu.memory_space<vmem>>, vector<128x16xf32>
    %cst_9 = arith.constant dense<0.000000e+00> : vector<8x128xf32>
    %14 = tpu.matmul %12, %13, %cst_9 {dimension_numbers = #tpu.dot_dimension_numbers<[1], [1], [0], [0], [0, 0, 1, 0], [], []>} : vector<8x16xf32>, vector<128x16xf32>, vector<8x128xf32> -> vector<8x128xf32>
    %15 = arith.addf %14, %11 : vector<8x128xf32>
    %cst_10 = arith.constant dense<0xFF800000> : vector<8xf32>
    %16 = vector.multi_reduction <maximumf>, %15, %cst_10 [1] : vector<8x128xf32> to vector<8xf32>
    %17 = vector.shape_cast %16 : vector<8xf32> to vector<8x1xf32>
    %18 = vector.broadcast %17 : vector<8x1xf32> to vector<8x128xf32>
    %19 = arith.subf %15, %18 : vector<8x128xf32>
    %20 = math.exp %19 : vector<8x128xf32>
    %cst_11 = arith.constant dense<0.000000e+00> : vector<8xf32>
    %21 = vector.multi_reduction <add>, %20, %cst_11 [1] : vector<8x128xf32> to vector<8xf32>
    %22 = vector.shape_cast %21 : vector<8xf32> to vector<8x1xf32>
    %23 = tpu.reciprocal %22 {approx = true} : vector<8x1xf32> -> vector<8x1xf32>
    %24 = vector.broadcast %23 : vector<8x1xf32> to vector<8x128xf32>
    %25 = arith.mulf %20, %24 : vector<8x128xf32>
    %26 = vector.extract_strided_slice %25 {offsets = [0, 0], sizes = [8, 8], strides = [1, 1]} : vector<8x128xf32> to vector<8x8xf32>
    %c0_12 = arith.constant 0 : index
    %c0_13 = arith.constant 0 : index
    %c0_14 = arith.constant 0 : index
    %c0_15 = arith.constant 0 : index
    %27 = vector.load %arg8[%c0_12, %c0_13, %c0_14, %c0_15] : memref<1x4x8x8xf32, #tpu.memory_space<vmem>>, vector<1x1x8x8xf32>
    %28 = vector.shape_cast %27 : vector<1x1x8x8xf32> to vector<8x8xf32>
    %29 = vector.shape_cast %26 : vector<8x8xf32> to vector<1x1x8x8xf32>
    tpu.vector_store %arg8[%c0_12, %c0_13, %c0_14, %c0_15], %29 {strides = array<i32>} : memref<1x4x8x8xf32, #tpu.memory_space<vmem>>, vector<1x1x8x8xf32>,
    %30 = vector.extract_strided_slice %7 {offsets = [0, 16], sizes = [8, 16], strides = [1, 1]} : vector<8x64xf32> to vector<8x16xf32>
    %c0_16 = arith.constant 0 : index
    %c16 = arith.constant 16 : index
    %31 = vector.load %arg9[%c0_16, %c16] : memref<128x64xf32, #tpu.memory_space<vmem>>, vector<128x16xf32>
    %cst_17 = arith.constant dense<0.000000e+00> : vector<8x128xf32>
    %32 = tpu.matmul %30, %31, %cst_17 {dimension_numbers = #tpu.dot_dimension_numbers<[1], [1], [0], [0], [0, 0, 1, 0], [], []>} : vector<8x16xf32>, vector<128x16xf32>, vector<8x128xf32> -> vector<8x128xf32>
    %33 = arith.addf %32, %11 : vector<8x128xf32>
    %cst_18 = arith.constant dense<0xFF800000> : vector<8xf32>
    %34 = vector.multi_reduction <maximumf>, %33, %cst_18 [1] : vector<8x128xf32> to vector<8xf32>
    %35 = vector.shape_cast %34 : vector<8xf32> to vector<8x1xf32>
    %36 = vector.broadcast %35 : vector<8x1xf32> to vector<8x128xf32>
    %37 = arith.subf %33, %36 : vector<8x128xf32>
    %38 = math.exp %37 : vector<8x128xf32>
    %cst_19 = arith.constant dense<0.000000e+00> : vector<8xf32>
    %39 = vector.multi_reduction <add>, %38, %cst_19 [1] : vector<8x128xf32> to vector<8xf32>
    %40 = vector.shape_cast %39 : vector<8xf32> to vector<8x1xf32>
    %41 = tpu.reciprocal %40 {approx = true} : vector<8x1xf32> -> vector<8x1xf32>
    %42 = vector.broadcast %41 : vector<8x1xf32> to vector<8x128xf32>
    %43 = arith.mulf %38, %42 : vector<8x128xf32>
    %44 = vector.extract_strided_slice %43 {offsets = [0, 0], sizes = [8, 8], strides = [1, 1]} : vector<8x128xf32> to vector<8x8xf32>
    %c0_20 = arith.constant 0 : index
    %c1 = arith.constant 1 : index
    %c0_21 = arith.constant 0 : index
    %c0_22 = arith.constant 0 : index
    %45 = vector.load %arg8[%c0_20, %c1, %c0_21, %c0_22] : memref<1x4x8x8xf32, #tpu.memory_space<vmem>>, vector<1x1x8x8xf32>
    %46 = vector.shape_cast %45 : vector<1x1x8x8xf32> to vector<8x8xf32>
    %47 = vector.shape_cast %44 : vector<8x8xf32> to vector<1x1x8x8xf32>
    tpu.vector_store %arg8[%c0_20, %c1, %c0_21, %c0_22], %47 {strides = array<i32>} : memref<1x4x8x8xf32, #tpu.memory_space<vmem>>, vector<1x1x8x8xf32>,
    %48 = vector.extract_strided_slice %7 {offsets = [0, 32], sizes = [8, 16], strides = [1, 1]} : vector<8x64xf32> to vector<8x16xf32>
    %c0_23 = arith.constant 0 : index
    %c32 = arith.constant 32 : index
    %49 = vector.load %arg9[%c0_23, %c32] : memref<128x64xf32, #tpu.memory_space<vmem>>, vector<128x16xf32>
    %cst_24 = arith.constant dense<0.000000e+00> : vector<8x128xf32>
    %50 = tpu.matmul %48, %49, %cst_24 {dimension_numbers = #tpu.dot_dimension_numbers<[1], [1], [0], [0], [0, 0, 1, 0], [], []>} : vector<8x16xf32>, vector<128x16xf32>, vector<8x128xf32> -> vector<8x128xf32>
    %51 = arith.addf %50, %11 : vector<8x128xf32>
    %cst_25 = arith.constant dense<0xFF800000> : vector<8xf32>
    %52 = vector.multi_reduction <maximumf>, %51, %cst_25 [1] : vector<8x128xf32> to vector<8xf32>
    %53 = vector.shape_cast %52 : vector<8xf32> to vector<8x1xf32>
    %54 = vector.broadcast %53 : vector<8x1xf32> to vector<8x128xf32>
    %55 = arith.subf %51, %54 : vector<8x128xf32>
    %56 = math.exp %55 : vector<8x128xf32>
    %cst_26 = arith.constant dense<0.000000e+00> : vector<8xf32>
    %57 = vector.multi_reduction <add>, %56, %cst_26 [1] : vector<8x128xf32> to vector<8xf32>
    %58 = vector.shape_cast %57 : vector<8xf32> to vector<8x1xf32>
    %59 = tpu.reciprocal %58 {approx = true} : vector<8x1xf32> -> vector<8x1xf32>
    %60 = vector.broadcast %59 : vector<8x1xf32> to vector<8x128xf32>
    %61 = arith.mulf %56, %60 : vector<8x128xf32>
    %62 = vector.extract_strided_slice %61 {offsets = [0, 0], sizes = [8, 8], strides = [1, 1]} : vector<8x128xf32> to vector<8x8xf32>
    %c0_27 = arith.constant 0 : index
    %c2 = arith.constant 2 : index
    %c0_28 = arith.constant 0 : index
    %c0_29 = arith.constant 0 : index
    %63 = vector.load %arg8[%c0_27, %c2, %c0_28, %c0_29] : memref<1x4x8x8xf32, #tpu.memory_space<vmem>>, vector<1x1x8x8xf32>
    %64 = vector.shape_cast %63 : vector<1x1x8x8xf32> to vector<8x8xf32>
    %65 = vector.shape_cast %62 : vector<8x8xf32> to vector<1x1x8x8xf32>
    tpu.vector_store %arg8[%c0_27, %c2, %c0_28, %c0_29], %65 {strides = array<i32>} : memref<1x4x8x8xf32, #tpu.memory_space<vmem>>, vector<1x1x8x8xf32>,
    %66 = vector.extract_strided_slice %7 {offsets = [0, 48], sizes = [8, 16], strides = [1, 1]} : vector<8x64xf32> to vector<8x16xf32>
    %c0_30 = arith.constant 0 : index
    %c48 = arith.constant 48 : index
    %67 = vector.load %arg9[%c0_30, %c48] : memref<128x64xf32, #tpu.memory_space<vmem>>, vector<128x16xf32>
    %cst_31 = arith.constant dense<0.000000e+00> : vector<8x128xf32>
    %68 = tpu.matmul %66, %67, %cst_31 {dimension_numbers = #tpu.dot_dimension_numbers<[1], [1], [0], [0], [0, 0, 1, 0], [], []>} : vector<8x16xf32>, vector<128x16xf32>, vector<8x128xf32> -> vector<8x128xf32>
    %69 = arith.addf %68, %11 : vector<8x128xf32>
    %cst_32 = arith.constant dense<0xFF800000> : vector<8xf32>
    %70 = vector.multi_reduction <maximumf>, %69, %cst_32 [1] : vector<8x128xf32> to vector<8xf32>
    %71 = vector.shape_cast %70 : vector<8xf32> to vector<8x1xf32>
    %72 = vector.broadcast %71 : vector<8x1xf32> to vector<8x128xf32>
    %73 = arith.subf %69, %72 : vector<8x128xf32>
    %74 = math.exp %73 : vector<8x128xf32>
    %cst_33 = arith.constant dense<0.000000e+00> : vector<8xf32>
    %75 = vector.multi_reduction <add>, %74, %cst_33 [1] : vector<8x128xf32> to vector<8xf32>
    %76 = vector.shape_cast %75 : vector<8xf32> to vector<8x1xf32>
    %77 = tpu.reciprocal %76 {approx = true} : vector<8x1xf32> -> vector<8x1xf32>
    %78 = vector.broadcast %77 : vector<8x1xf32> to vector<8x128xf32>
    %79 = arith.mulf %74, %78 : vector<8x128xf32>
    %80 = vector.extract_strided_slice %79 {offsets = [0, 0], sizes = [8, 8], strides = [1, 1]} : vector<8x128xf32> to vector<8x8xf32>
    %c0_34 = arith.constant 0 : index
    %c3 = arith.constant 3 : index
    %c0_35 = arith.constant 0 : index
    %c0_36 = arith.constant 0 : index
    %81 = vector.load %arg8[%c0_34, %c3, %c0_35, %c0_36] : memref<1x4x8x8xf32, #tpu.memory_space<vmem>>, vector<1x1x8x8xf32>
    %82 = vector.shape_cast %81 : vector<1x1x8x8xf32> to vector<8x8xf32>
    %83 = vector.shape_cast %80 : vector<8x8xf32> to vector<1x1x8x8xf32>
    tpu.vector_store %arg8[%c0_34, %c3, %c0_35, %c0_36], %83 {strides = array<i32>} : memref<1x4x8x8xf32, #tpu.memory_space<vmem>>, vector<1x1x8x8xf32>,
    return
  }
  func.func @transform_0(%arg0: i32, %arg1: i32, %arg2: i32) -> (i32, i32, i32) {
    %c0_i32 = arith.constant 0 : i32
    %c0_i32_0 = arith.constant 0 : i32
    return %arg0, %arg2, %c0_i32 : i32, i32, i32
  }
  func.func @transform_1(%arg0: i32, %arg1: i32, %arg2: i32) -> (i32, i32, i32) {
    %c0_i32 = arith.constant 0 : i32
    %c0_i32_0 = arith.constant 0 : i32
    %c0_i32_1 = arith.constant 0 : i32
    return %arg0, %c0_i32, %c0_i32_0 : i32, i32, i32
  }
  func.func @transform_2(%arg0: i32, %arg1: i32, %arg2: i32) -> (i32, i32, i32) {
    %c0_i32 = arith.constant 0 : i32
    %c0_i32_0 = arith.constant 0 : i32
    %c0_i32_1 = arith.constant 0 : i32
    return %arg1, %c0_i32, %c0_i32_0 : i32, i32, i32
  }
  func.func @transform_3(%arg0: i32, %arg1: i32, %arg2: i32) -> (i32, i32, i32) {
    %c0_i32 = arith.constant 0 : i32
    %c0_i32_0 = arith.constant 0 : i32
    %c0_i32_1 = arith.constant 0 : i32
    return %arg1, %c0_i32, %c0_i32_0 : i32, i32, i32
  }
  func.func @transform_4(%arg0: i32, %arg1: i32, %arg2: i32) -> (i32, i32) {
    %c0_i32 = arith.constant 0 : i32
    %c0_i32_0 = arith.constant 0 : i32
    %c0_i32_1 = arith.constant 0 : i32
    return %c0_i32, %c0_i32_0 : i32, i32
  }
  func.func @transform_5(%arg0: i32, %arg1: i32, %arg2: i32) -> (i32, i32, i32, i32) {
    %c0_i32 = arith.constant 0 : i32
    %c0_i32_0 = arith.constant 0 : i32
    return %arg0, %arg1, %arg2, %c0_i32 : i32, i32, i32, i32
  }
}

</mosaic_0001>

<bundles_post_ra>
// kernel: tpu_custom_call.1
= control target key start
LH: loop header
LB: loop body
LE: loop exit
PB: predicated region body
PF: predicated region fallthrough
CT: control target
= control target key end

     0   :  { %10 = vsyncpa [#allocation4], 0  ;;  %s2489_s0 = inlined_call_operand.vmem [shape: f32[2,8,32], index: 0, kind: input, shape index: {}]   ;;  %s2490_s1 = inlined_call_operand.vmem [shape: f32[2,128,32], index: 1, kind: input, shape index: {}]   ;;  %s2491_s2 = inlined_call_operand.vmem [shape: f32[1,32,64], index: 2, kind: input, shape index: {}]   ;;  %s2492_s3 = inlined_call_operand.vmem [shape: f32[1,32,64], index: 3, kind: input, shape index: {}]   ;;  %s2493_s4 = inlined_call_operand.vmem [shape: f32[8,128], index: 4, kind: input, shape index: {}]   ;;  %s2494_s5 = inlined_call_operand.hbm [shape: f32[2,4,8,8], index: 5, kind: output, shape index: {}]  }
   0x1   :  { %12 = vsyncpa [#allocation4 + $0x1], 0  ;;  %s2041_s18 = smov 0   ;;  %s2043_s19 = smov 0  }
   0x2   :  { %s2045_s20 = smov 0   ;;  %s2047_s21 = smov 0  }
   0x3   :  { %s2049_s22 = smov 0   ;;  %s2051_s23 = smov 0  }
   0x4 LB: > { %s1465_s24 = sadd.s32 4294967295, %s2001_s23   ;;  %s1466_s25 = sadd.s32 4294967294, %s2001_s23   ;;  %s2001_s23 = sphi %s2051_s23, %s18_s23   ;;  %s1997_s22 = sphi %s2049_s22, %s2501_s22   ;;  %s1993_s21 = sphi %s2047_s21, %s2500_s21   ;;  %s1989_s20 = sphi %s2045_s20, %s2499_s20   ;;  %s1985_s19 = sphi %s2043_s19, %s2498_s19   ;;  %s1981_s18 = sphi %s2041_s18, %s2497_s18  }
   0x5   : > { %s37_s26 = sadd.s32 1, %s1997_s22  ;;  %s175_s27 = sadd.s32 1, %s1989_s20 }
   0x6   : > { %p39_p0 = scmp.ge.s32.totalorder %s37_s26, 2  ;;  %p185_p1 = scmp.ne.s32.totalorder %s1989_s20, %s1985_s19 }
   0x7   : > { %p186_p2 = scmp.eq.s32.totalorder %s1465_s24, 1  ;;  %p191_p3 = scmp.ne.s32.totalorder %s1985_s19, %s1981_s18 }
   0x8   : > { %s2503_s26 = smov (%p39_p0, %s37_s26), 0  ;;  %p192_p5 = scmp.eq.s32.totalorder %s1466_s25, 1 }
   0x9   : > { %p2081_p4 = por %p186_p2, %p185_p1  ;;  %s168_s29 = ssub.s32 %s1997_s22, %s2503_s26 }
   0xa   : > { %p1471_p6 = scmp.ge.s32.totalorder %s2001_s23, 1  ;;  %p173_p7 = scmp.eq.s32.totalorder %s168_s29, 0 }
   0xb   : > { %p2088_p8 = por %p192_p5, %p191_p3  ;;  %p247_p9 = scmp.lt.s32.totalorder %s2001_s23, 3 }
   0xc   : > { %s2094_s6 = scalar_select %p173_p7, %s1989_s20, %s175_s27  }
   0xd   : > { %p248_p10 = pnand %p1471_p6, %p247_p9 }
   0xe   : > { %p292_p11 = scmp.lt.s32.totalorder (!%p248_p10), %s1993_s21, 1  ;;  %s2006_s24 = smov (!%p248_p10), 96  }
   0xf   : > { %251 = sbr.rel (%p248_p10) target bundleno = 1019 (0x3fb), region = 40  ;;  %s2007_s25 = smov (!%p248_p10), 80  }
  0x14   : > { %v338_v0 = vld [vmem:[%s2492_s3 + $0x18] sm:$0xff]  ;;  %v337_v1 = vld [vmem:[%s2492_s3 + $0x10] sm:$0xff]  ;;  %v2003_v2 = vmov 0.0   ;;  %v336_v5 = vld [vmem:[%s2492_s3 + $0x8] sm:$0xff]  ;;  %s293_s17 = scalar_select %p292_p11, %s1993_s21, 1  ;;  %vm339_vm0 = vcmask 261120  }
  0x15   : > { %1664 = vmatprep.subr.mxu0 %v338_v0  ;;  %1696 = vmatprep.subr.mxu1 %v2003_v2  ;;  %v554_v3 = vld [vmem:[%s2491_s2 + $0x18] sm:$0xff]  ;;  %v553_v4 = vld [vmem:[%s2491_s2 + $0x10] sm:$0xff]  ;;  %v552_v6 = vld [vmem:[%s2491_s2 + $0x8] sm:$0xff]  ;;  %vm2004_vm1 = vmmov 0   ;;  %vm533_vm2 = vcmask 523264   ;;  %vm648_vm3 = vcmask 130048  }
  0x16   : > { %1665 = vmatpush3.msra.mxu0 %v338_v0  ;;  %1697 = vmatpush3.msra.mxu1 %v554_v3  ;;  %v335_v7 = vld [vmem:[%s2492_s3] sm:$0xff]  ;;  %s1569_s7 = sshll.u32 %s293_s17, 7  ;;  %s1473_s11 = sshll.u32 %s293_s17, 3  ;;  %vm779_vm4 = vcmask 64512  }
  0x17   : > { %1666 = vmatprep.subr.mxu0 %v337_v1  ;;  %1698 = vmatprep.subr.mxu1 %v2003_v2  ;;  %s2124_s10 = scalar_lea.vmem %s2490_s1, %s1569_s7  ;;  %v551_v10 = vld [vmem:[%s2491_s2] sm:$0xff]  ;;  %s298_s16 = scalar_lea.vmem %s2489_s0, %s1473_s11 }
  0x18   : > { %1667 = vmatpush3.msra.mxu0 %v337_v1  ;;  %1699 = vmatpush3.msra.mxu1 %v553_v4  ;;  %v319_v8 = vld [vmem:[%s2124_s10] sm:$0xff]  ;;  %v320_v9 = vld [vmem:[%s2124_s10 + $0x8] sm:$0xff]  ;;  %v321_v11 = vld [vmem:[%s2124_s10 + $0x10] sm:$0xff]  ;;  %s2005_s17 = smov 112   ;;  %s289_s7 = sand.u32 1, %s1985_s19  }
  0x19   : > { %1668 = vmatprep.subr.mxu0 %v336_v5  ;;  %1700 = vmatprep.subr.mxu1 %v2003_v2  ;;  %v322_v12 = vld [vmem:[%s2124_s10 + $0x18] sm:$0xff]  ;;  %v323_v13 = vld [vmem:[%s2124_s10 + $0x20] sm:$0xff]  ;;  %v324_v15 = vld [vmem:[%s2124_s10 + $0x28] sm:$0xff]  ;;  %s1472_s8 = sshll.u32 %s289_s7, 5  ;;  %s2444_s15 = scalar_lea.sflag [#allocation4], %s289_s7 }
  0x1a   : > { %1669 = vmatpush3.msra.mxu0 %v336_v5  ;;  %1701 = vmatpush3.msra.mxu1 %v552_v6  ;;  %v550_v14 = vld [vmem:[%s298_s16] sm:$0xff]  ;;  %v325_v16 = vld [vmem:[%s2124_s10 + $0x30] sm:$0xff]  ;;  %v326_v17 = vld [vmem:[%s2124_s10 + $0x38] sm:$0xff]  ;;  %s291_s9 = scalar_lea.vmem [#allocation3], %s1472_s8 }
  0x1b   : > { %1670 = vmatprep.subr.mxu0 %v335_v7  ;;  %1672 = vmatprep.mubr.msk.f32.mxu0 %vm339_vm0, %v319_v8  ;;  %v327_v18 = vld [vmem:[%s2124_s10 + $0x40] sm:$0xff]  ;;  %v328_v19 = vld [vmem:[%s2124_s10 + $0x48] sm:$0xff]  ;;  %v329_v20 = vld [vmem:[%s2124_s10 + $0x50] sm:$0xff]  ;;  %s1341_s11 = sshll.u32 %s291_s9, 4  ;;  %s2439_s11 = int_to_ptr.vmem [resolvable:$true] %s1341_s11 }
  0x1c   : > { %1671 = vmatpush3.msra.mxu0 %v335_v7  ;;  %1702 = vmatprep.subr.mxu1 %v2003_v2  ;;  %v330_v21 = vld [vmem:[%s2124_s10 + $0x58] sm:$0xff]  ;;  %v331_v22 = vld [vmem:[%s2124_s10 + $0x60] sm:$0xff]  ;;  %v332_v23 = vld [vmem:[%s2124_s10 + $0x68] sm:$0xff]  ;;  %s1925_s16 = scalar_lea.vmem %s2439_s11, 512 }
  0x1d   : > { %1673 = vmatmul.mubr.msk.f32.vlgmr.msra.gmra.mxu0 %vm339_vm0, %v320_v9  ;;  %1703 = vmatpush3.msra.mxu1 %v551_v10  ;;  %v333_v24 = vld [vmem:[%s2124_s10 + $0x70] sm:$0xff]  ;;  %v334_v25 = vld [vmem:[%s2124_s10 + $0x78] sm:$0xff]  ;;  %s1570_s10 = sshll.u32 %s1993_s21, 9  ;;  %p1926_p12 = scmp.ne.s32.totalorder %s2439_s11, %s1925_s16 }
  0x1e   : > { %1675 = vmatprep.mubr.msk.f32.mxu0 %vm339_vm0, %v321_v11  ;;  %1704 = vmatprep.mubr.msk.f32.mxu1 %vm2004_vm1, %v2003_v2  ;;  %s2437_s14 = scalar_lea.hbm %s2494_s5, %s1570_s10  ;;  %s2008_s21 = smov [#allocation3]  }
  0x1f   : > { %1707 = vmatprep.subr.mxu0 %v2003_v2  ;;  %1742 = vmatprep.subr.mxu1 %v2003_v2  ;;  %p1927_p13 = pnand %p1926_p12, %p2081_p4 }
  0x20   : > { %1705 = vmatmul.mubr.msk.f32.vlgmr.msra.gmra.mxu1 %vm339_vm0, %v550_v14 }
  0x21   : > { %1676 = vmatmul.mubr.msk.f32.gmra.mxu0 %vm339_vm0, %v322_v12  ;;  %1774 = vmatprep.mubr.msk.f32.mxu1 %vm2004_vm1, %v2003_v2  ;;  %p1928_p0 = pneg %p1927_p13 }
  0x22   : > { %1678 = vmatprep.mubr.msk.f32.mxu0 %vm339_vm0, %v323_v13 }
  0x25   : > { %1679 = vmatmul.mubr.msk.f32.gmra.mxu0 %vm339_vm0, %v324_v15 }
  0x26   : > { %1681 = vmatprep.mubr.msk.f32.mxu0 %vm339_vm0, %v325_v16 }
  0x29   : > { %1682 = vmatmul.mubr.msk.f32.gmra.mxu0 %vm339_vm0, %v326_v17 }
  0x2a   : > { %1684 = vmatprep.mubr.msk.f32.mxu0 %vm339_vm0, %v327_v18 }
  0x2d   : > { %1685 = vmatmul.mubr.msk.f32.gmra.mxu0 %vm339_vm0, %v328_v19 }
  0x2e   : > { %1687 = vmatprep.mubr.msk.f32.mxu0 %vm339_vm0, %v329_v20 }
  0x31   : > { %1688 = vmatmul.mubr.msk.f32.gmra.mxu0 %vm339_vm0, %v330_v21 }
  0x32   : > { %1690 = vmatprep.mubr.msk.f32.mxu0 %vm339_vm0, %v331_v22 }
  0x35   : > { %1691 = vmatmul.mubr.msk.f32.gmra.mxu0 %vm339_vm0, %v332_v23 }
  0x36   : > { %1693 = vmatprep.mubr.msk.f32.mxu0 %vm339_vm0, %v333_v24 }
  0x39   : > { %1694 = vmatmul.mubr.msk.f32.gmra.mxu0 %vm339_vm0, %v334_v25 }
  0x3a   : > { %1739 = vmatprep.mubr.msk.f32.mxu0 %vm2004_vm1, %v2003_v2 }
  0xdd   : > { %v1674_v26 = vpop.f32.mrf.mxu0 }
  0xde   : > { %535 = vst.msk [vmem:[#allocation2 + $0x8] sm:$0xff] %vm533_vm2, %v1674_v26 }
  0xdf   : > { %v454_v27 = vpop.f32.mrf.mxu0 }
  0xe0   : > { %534 = vst.msk [vmem:[#allocation2] sm:$0xff] %vm533_vm2, %v454_v27  ;;  %v2177_v28 = vpop.f32.mrf.mxu1 }
  0xe1   : > { %v1677_v29 = vpop.f32.mrf.mxu0 }
  0xe2   : > { %537 = vst.msk [vmem:[#allocation2 + $0x18] sm:$0xff] %vm533_vm2, %v1677_v29  ;;  %v1706_v30 = vpop.f32.mrf.mxu1 }
  0xe3   : > { %v464_v31 = vpop.f32.mrf.mxu0 }
  0xe4   : > { %536 = vst.msk [vmem:[#allocation2 + $0x10] sm:$0xff] %vm533_vm2, %v464_v31 }
  0xe5   : > { %v1680_v32 = vpop.f32.mrf.mxu0  ;;  %v782_v59 = vld [vmem:[#allocation2 + $0x8] sm:$0xff] }
  0xe6   : > { %539 = vst.msk [vmem:[#allocation2 + $0x28] sm:$0xff] %vm533_vm2, %v1680_v32 }
  0xe7   : > { %v474_v33 = vpop.f32.mrf.mxu0  ;;  %v781_v57 = vld [vmem:[#allocation2] sm:$0xff] }
  0xe8   : > { %538 = vst.msk [vmem:[#allocation2 + $0x20] sm:$0xff] %vm533_vm2, %v474_v33 }
  0xe9   : > { %v1683_v34 = vpop.f32.mrf.mxu0  ;;  %v784_v58 = vld [vmem:[#allocation2 + $0x18] sm:$0xff] }
  0xea   : > { %541 = vst.msk [vmem:[#allocation2 + $0x38] sm:$0xff] %vm533_vm2, %v1683_v34 }
  0xeb   : > { %v484_v35 = vpop.f32.mrf.mxu0  ;;  %v2234_v55 = vld [vmem:[#allocation2 + $0x10] sm:$0xff] }
  0xec   : > { %540 = vst.msk [vmem:[#allocation2 + $0x30] sm:$0xff] %vm533_vm2, %v484_v35 }
  0xed   : > { %v1686_v36 = vpop.f32.mrf.mxu0  ;;  %v786_v56 = vld [vmem:[#allocation2 + $0x28] sm:$0xff] }
  0xee   : > { %543 = vst.msk [vmem:[#allocation2 + $0x48] sm:$0xff] %vm533_vm2, %v1686_v36 }
  0xef   : > { %v494_v37 = vpop.f32.mrf.mxu0  ;;  %v2227_v53 = vld [vmem:[#allocation2 + $0x20] sm:$0xff] }
  0xf0   : > { %542 = vst.msk [vmem:[#allocation2 + $0x40] sm:$0xff] %vm533_vm2, %v494_v37 }
  0xf1   : > { %v1689_v38 = vpop.f32.mrf.mxu0  ;;  %v788_v54 = vld [vmem:[#allocation2 + $0x38] sm:$0xff] }
  0xf2   : > { %545 = vst.msk [vmem:[#allocation2 + $0x58] sm:$0xff] %vm533_vm2, %v1689_v38 }
  0xf3   : > { %v504_v39 = vpop.f32.mrf.mxu0  ;;  %v2219_v51 = vld [vmem:[#allocation2 + $0x30] sm:$0xff] }
  0xf4   : > { %544 = vst.msk [vmem:[#allocation2 + $0x50] sm:$0xff] %vm533_vm2, %v504_v39 }
  0xf5   : > { %v1692_v40 = vpop.f32.mrf.mxu0  ;;  %v790_v52 = vld [vmem:[#allocation2 + $0x48] sm:$0xff] }
  0xf6   : > { %547 = vst.msk [vmem:[#allocation2 + $0x68] sm:$0xff] %vm533_vm2, %v1692_v40 }
  0xf7   : > { %v514_v41 = vpop.f32.mrf.mxu0  ;;  %v2211_v49 = vld [vmem:[#allocation2 + $0x40] sm:$0xff] }
  0xf8   : > { %546 = vst.msk [vmem:[#allocation2 + $0x60] sm:$0xff] %vm533_vm2, %v514_v41 }
  0xf9   : > { %v1695_v42 = vpop.f32.mrf.mxu0  ;;  %v792_v50 = vld [vmem:[#allocation2 + $0x58] sm:$0xff] }
  0xfa   : > { %549 = vst.msk [vmem:[#allocation2 + $0x78] sm:$0xff] %vm533_vm2, %v1695_v42 }
  0xfb   : > { %v524_v43 = vpop.f32.mrf.mxu0  ;;  %v2204_v47 = vld [vmem:[#allocation2 + $0x50] sm:$0xff] }
  0xfc   : > { %548 = vst.msk [vmem:[#allocation2 + $0x70] sm:$0xff] %vm533_vm2, %v524_v43 }
  0xfd   : > { %v2193_v44 = vld [vmem:[#allocation2 + $0x68] sm:$0xff] }
  0xfe   : > { %841 = vrot.lane.b32.xlu1 %v2193_v44, %s2005_s17 }
  0xff   : > { %v2197_v45 = vld [vmem:[#allocation2 + $0x60] sm:$0xff] }
 0x101   : > { %v796_v46 = vld [vmem:[#allocation2 + $0x78] sm:$0xff] }
 0x102   : > { %839 = vrot.lane.b32.xlu1 %v2197_v45, %s2005_s17  ;;  %845 = vrot.lane.b32.xlu0 %v796_v46, %s2005_s17 }
 0x103   : > { %1708 = vmatpush3.xpose.msk.msra.mxu0 %vm648_vm3, %v796_v46  ;;  %v795_v48 = vld [vmem:[#allocation2 + $0x70] sm:$0xff] }
 0x104   : > { %1709 = vmatprep.subr.mxu0 %v2003_v2 }
 0x106   : > { %835 = vrot.lane.b32.xlu1 %v2204_v47, %s2005_s17  ;;  %843 = vrot.lane.b32.xlu0 %v795_v48, %s2005_s17 }
 0x107   : > { %1710 = vmatpush3.xpose.msk.msra.mxu0 %vm648_vm3, %v795_v48 }
 0x108   : > { %1711 = vmatprep.subr.mxu0 %v2003_v2 }
 0x10a   : > { %831 = vrot.lane.b32.xlu1 %v2211_v49, %s2005_s17  ;;  %837 = vrot.lane.b32.xlu0 %v792_v50, %s2005_s17 }
 0x10b   : > { %1712 = vmatpush3.xpose.msk.msra.mxu0 %vm648_vm3, %v2193_v44 }
 0x10c   : > { %1713 = vmatprep.subr.mxu0 %v2003_v2 }
 0x10e   : > { %827 = vrot.lane.b32.xlu1 %v2219_v51, %s2005_s17  ;;  %833 = vrot.lane.b32.xlu0 %v790_v52, %s2005_s17 }
 0x10f   : > { %1714 = vmatpush3.xpose.msk.msra.mxu0 %vm648_vm3, %v2197_v45 }
 0x110   : > { %1715 = vmatprep.subr.mxu0 %v2003_v2 }
 0x112   : > { %823 = vrot.lane.b32.xlu1 %v2227_v53, %s2005_s17  ;;  %829 = vrot.lane.b32.xlu0 %v788_v54, %s2005_s17 }
 0x113   : > { %1716 = vmatpush3.xpose.msk.msra.mxu0 %vm648_vm3, %v792_v50 }
 0x114   : > { %1717 = vmatprep.subr.mxu0 %v2003_v2 }
 0x116   : > { %819 = vrot.lane.b32.xlu1 %v2234_v55, %s2005_s17  ;;  %825 = vrot.lane.b32.xlu0 %v786_v56, %s2005_s17 }
 0x117   : > { %1718 = vmatpush3.xpose.msk.msra.mxu0 %vm648_vm3, %v2204_v47 }
 0x118   : > { %1719 = vmatprep.subr.mxu0 %v2003_v2 }
 0x11a   : > { %815 = vrot.lane.b32.xlu1 %v781_v57, %s2005_s17  ;;  %821 = vrot.lane.b32.xlu0 %v784_v58, %s2005_s17 }
 0x11b   : > { %1720 = vmatpush3.xpose.msk.msra.mxu0 %vm648_vm3, %v790_v52 }
 0x11c   : > { %1721 = vmatprep.subr.mxu0 %v2003_v2 }
 0x11e   : > { %1026 = vrot.lane.b32.xlu1 %v796_v46, %s2006_s24  ;;  %817 = vrot.lane.b32.xlu0 %v782_v59, %s2005_s17 }
 0x11f   : > { %1722 = vmatpush3.xpose.msk.msra.mxu0 %vm648_vm3, %v2211_v49 }
 0x120   : > { %1723 = vmatprep.subr.mxu0 %v2003_v2 }
 0x122   : > { %1024 = vrot.lane.b32.xlu1 %v795_v48, %s2006_s24  ;;  %797 = vrot.lane.b32.xlu0 %v2177_v28, %s2005_s17  ;;  %s1929_s17 = sshll.u32 %s2008_s21, 4  ;;  %s1930_s17 = int_to_ptr.vmem [resolvable:$false] %s1929_s17 }
 0x123   : > { %1724 = vmatpush3.xpose.msk.msra.mxu0 %vm648_vm3, %v788_v54  ;;  %p1932_p1 = scmp.lt.s32.totalorder %s2439_s11, %s1930_s17 }
 0x124   : > { %1725 = vmatprep.subr.mxu0 %v2003_v2 }
 0x126   : > { %1022 = vrot.lane.b32.xlu1 %v2193_v44, %s2006_s24  ;;  %1207 = vrot.lane.b32.xlu0 %v796_v46, %s2007_s25 }
 0x127   : > { %1726 = vmatpush3.xpose.msk.msra.mxu0 %vm648_vm3, %v2219_v51 }
 0x128   : > { %1727 = vmatprep.subr.mxu0 %v2003_v2 }
 0x12a   : > { %1020 = vrot.lane.b32.xlu1 %v2197_v45, %s2006_s24  ;;  %1205 = vrot.lane.b32.xlu0 %v795_v48, %s2007_s25  ;;  %v631_v48 = vld [vmem:[%s2493_s4] sm:$0xff] }
 0x12b   : > { %1728 = vmatpush3.xpose.msk.msra.mxu0 %vm648_vm3, %v786_v56 }
 0x12c   : > { %1729 = vmatprep.subr.mxu0 %v2003_v2 }
 0x12e   : > { %1018 = vrot.lane.b32.xlu1 %v792_v50, %s2006_s24  ;;  %1203 = vrot.lane.b32.xlu0 %v2193_v44, %s2007_s25 }
 0x12f   : > { %1730 = vmatpush3.xpose.msk.msra.mxu0 %vm648_vm3, %v2227_v53 }
 0x130   : > { %1731 = vmatprep.subr.mxu0 %v2003_v2 }
 0x132   : > { %1016 = vrot.lane.b32.xlu1 %v2204_v47, %s2006_s24  ;;  %1201 = vrot.lane.b32.xlu0 %v2197_v45, %s2007_s25 }
 0x133   : > { %1732 = vmatpush3.xpose.msk.msra.mxu0 %vm648_vm3, %v784_v58 }
 0x134   : > { %1733 = vmatprep.subr.mxu0 %v2003_v2 }
 0x136   : > { %1014 = vrot.lane.b32.xlu1 %v790_v52, %s2006_s24  ;;  %1199 = vrot.lane.b32.xlu0 %v792_v50, %s2007_s25 }
 0x137   : > { %1734 = vmatpush3.xpose.msk.msra.mxu0 %vm648_vm3, %v2234_v55 }
 0x138   : > { %1735 = vmatprep.subr.mxu0 %v2003_v2 }
 0x13a   : > { %1012 = vrot.lane.b32.xlu1 %v2211_v49, %s2006_s24  ;;  %1197 = vrot.lane.b32.xlu0 %v2204_v47, %s2007_s25 }
 0x13b   : > { %1736 = vmatpush3.xpose.msk.msra.mxu0 %vm648_vm3, %v782_v59 }
 0x13c   : > { %1737 = vmatprep.subr.mxu0 %v2003_v2 }
 0x13e   : > { %1010 = vrot.lane.b32.xlu1 %v788_v54, %s2006_s24  ;;  %1195 = vrot.lane.b32.xlu0 %v790_v52, %s2007_s25 }
 0x13f   : > { %1738 = vmatpush3.xpose.msk.msra.mxu0 %vm648_vm3, %v781_v57 }
 0x140   : > { %1777 = vmatprep.subr.mxu0 %v2003_v2 }
 0x142   : > { %1740 = vmatmul.mubr.msk.f32.vlgmr.msra.gmra.mxu0 %vm648_vm3, %v2177_v28  ;;  %1008 = vrot.lane.b32.xlu1 %v2219_v51, %s2006_s24 }
 0x143   : > { %1193 = vrot.lane.b32.xlu0 %v2211_v49, %s2007_s25  ;;  %1809 = vmatprep.mubr.msk.f32.mxu0 %vm2004_vm1, %v2003_v2 }
 0x146   : > { %1006 = vrot.lane.b32.xlu1 %v786_v56, %s2006_s24 }
 0x147   : > { %1191 = vrot.lane.b32.xlu0 %v788_v54, %s2007_s25 }
 0x14a   : > { %1004 = vrot.lane.b32.xlu1 %v2227_v53, %s2006_s24 }
 0x14b   : > { %1189 = vrot.lane.b32.xlu0 %v2219_v51, %s2007_s25 }
 0x14e   : > { %1002 = vrot.lane.b32.xlu1 %v784_v58, %s2006_s24 }
 0x14f   : > { %1187 = vrot.lane.b32.xlu0 %v786_v56, %s2007_s25 }
 0x152   : > { %1000 = vrot.lane.b32.xlu1 %v2234_v55, %s2006_s24 }
 0x153   : > { %1185 = vrot.lane.b32.xlu0 %v2227_v53, %s2007_s25 }
 0x156   : > { %998 = vrot.lane.b32.xlu1 %v782_v59, %s2006_s24 }
 0x157   : > { %1183 = vrot.lane.b32.xlu0 %v784_v58, %s2007_s25 }
 0x15a   : > { %996 = vrot.lane.b32.xlu1 %v781_v57, %s2006_s24 }
 0x15b   : > { %1181 = vrot.lane.b32.xlu0 %v2234_v55, %s2007_s25 }
 0x15e   : > { %978 = vrot.lane.b32.xlu1 %v2177_v28, %s2006_s24  ;;  %s1931_s24 = scalar_lea.vmem %s1930_s17, 1024 }
 0x15f   : > { %1179 = vrot.lane.b32.xlu0 %v782_v59, %s2007_s25  ;;  %p1933_p2 = scmp.lt.s32.totalorder %s1931_s24, %s1925_s16 }
 0x161   : > { %p1934_p3 = por %p1933_p2, %p1932_p1 }
 0x163   : > { %1177 = vrot.lane.b32.xlu0 %v781_v57, %s2007_s25  ;;  %p1935_p5 = pnand %p1934_p3, %p1928_p0 }
 0x167   : > { %1159 = vrot.lane.b32.xlu0 %v2177_v28, %s2007_s25 }
 0x170   : > { %v842_v60 = vpop.permute.xlu1 %841 }
 0x174   : > { %v840_v61 = vpop.permute.xlu1 %839  ;;  %v846_v62 = vpop.permute.xlu0 %845 }
 0x175   : > { %1743 = vmatpush3.xpose.msk.msra.mxu1 %vm648_vm3, %v846_v62 }
 0x176   : > { %1744 = vmatprep.subr.mxu1 %v2003_v2 }
 0x178   : > { %v836_v63 = vpop.permute.xlu1 %835  ;;  %v844_v0 = vpop.permute.xlu0 %843 }
 0x179   : > { %1745 = vmatpush3.xpose.msk.msra.mxu1 %vm648_vm3, %v844_v0 }
 0x17a   : > { %1746 = vmatprep.subr.mxu1 %v2003_v2 }
 0x17c   : > { %v832_v1 = vpop.permute.xlu1 %831  ;;  %v838_v3 = vpop.permute.xlu0 %837 }
 0x17d   : > { %1747 = vmatpush3.xpose.msk.msra.mxu1 %vm648_vm3, %v842_v60 }
 0x17e   : > { %1748 = vmatprep.subr.mxu1 %v2003_v2 }
 0x180   : > { %v828_v4 = vpop.permute.xlu1 %827  ;;  %v834_v5 = vpop.permute.xlu0 %833 }
 0x181   : > { %1749 = vmatpush3.xpose.msk.msra.mxu1 %vm648_vm3, %v840_v61 }
 0x182   : > { %1750 = vmatprep.subr.mxu1 %v2003_v2 }
 0x184   : > { %v824_v6 = vpop.permute.xlu1 %823  ;;  %v830_v7 = vpop.permute.xlu0 %829 }
 0x185   : > { %1751 = vmatpush3.xpose.msk.msra.mxu1 %vm648_vm3, %v838_v3 }
 0x186   : > { %1752 = vmatprep.subr.mxu1 %v2003_v2 }
 0x188   : > { %v820_v8 = vpop.permute.xlu1 %819  ;;  %v826_v9 = vpop.permute.xlu0 %825 }
 0x189   : > { %1753 = vmatpush3.xpose.msk.msra.mxu1 %vm648_vm3, %v836_v63 }
 0x18a   : > { %1754 = vmatprep.subr.mxu1 %v2003_v2 }
 0x18c   : > { %v816_v10 = vpop.permute.xlu1 %815  ;;  %v822_v11 = vpop.permute.xlu0 %821 }
 0x18d   : > { %1755 = vmatpush3.xpose.msk.msra.mxu1 %vm648_vm3, %v834_v5 }
 0x18e   : > { %1756 = vmatprep.subr.mxu1 %v2003_v2 }
 0x190   : > { %v1027_v12 = vpop.permute.xlu1 %1026  ;;  %v818_v13 = vpop.permute.xlu0 %817 }
 0x191   : > { %1757 = vmatpush3.xpose.msk.msra.mxu1 %vm648_vm3, %v832_v1  ;;  %1778 = vmatpush3.xpose.msk.msra.mxu0 %vm648_vm3, %v1027_v12 }
 0x192   : > { %1758 = vmatprep.subr.mxu1 %v2003_v2  ;;  %1779 = vmatprep.subr.mxu0 %v2003_v2 }
 0x194   : > { %v1025_v14 = vpop.permute.xlu1 %1024  ;;  %v798_v15 = vpop.permute.xlu0 %797 }
 0x195   : > { %1759 = vmatpush3.xpose.msk.msra.mxu1 %vm648_vm3, %v830_v7  ;;  %1780 = vmatpush3.xpose.msk.msra.mxu0 %vm648_vm3, %v1025_v14 }
 0x196   : > { %1760 = vmatprep.subr.mxu1 %v2003_v2  ;;  %1781 = vmatprep.subr.mxu0 %v2003_v2 }
 0x198   : > { %v1023_v16 = vpop.permute.xlu1 %1022  ;;  %v1208_v17 = vpop.permute.xlu0 %1207 }
 0x199   : > { %1761 = vmatpush3.xpose.msk.msra.mxu1 %vm648_vm3, %v828_v4  ;;  %1782 = vmatpush3.xpose.msk.msra.mxu0 %vm648_vm3, %v1023_v16 }
 0x19a   : > { %1762 = vmatprep.subr.mxu1 %v2003_v2  ;;  %1783 = vmatprep.subr.mxu0 %v2003_v2 }
 0x19c   : > { %v1021_v18 = vpop.permute.xlu1 %1020  ;;  %v1206_v19 = vpop.permute.xlu0 %1205 }
 0x19d   : > { %1763 = vmatpush3.xpose.msk.msra.mxu1 %vm648_vm3, %v826_v9  ;;  %1784 = vmatpush3.xpose.msk.msra.mxu0 %vm648_vm3, %v1021_v18 }
 0x19e   : > { %1764 = vmatprep.subr.mxu1 %v2003_v2  ;;  %1785 = vmatprep.subr.mxu0 %v2003_v2 }
 0x1a0   : > { %v1019_v20 = vpop.permute.xlu1 %1018  ;;  %v1204_v21 = vpop.permute.xlu0 %1203 }
 0x1a1   : > { %1765 = vmatpush3.xpose.msk.msra.mxu1 %vm648_vm3, %v824_v6  ;;  %1786 = vmatpush3.xpose.msk.msra.mxu0 %vm648_vm3, %v1019_v20 }
 0x1a2   : > { %1766 = vmatprep.subr.mxu1 %v2003_v2  ;;  %1787 = vmatprep.subr.mxu0 %v2003_v2 }
 0x1a4   : > { %v1017_v22 = vpop.permute.xlu1 %1016  ;;  %v1202_v23 = vpop.permute.xlu0 %1201 }
 0x1a5   : > { %1767 = vmatpush3.xpose.msk.msra.mxu1 %vm648_vm3, %v822_v11  ;;  %1788 = vmatpush3.xpose.msk.msra.mxu0 %vm648_vm3, %v1017_v22 }
 0x1a6   : > { %1768 = vmatprep.subr.mxu1 %v2003_v2  ;;  %1789 = vmatprep.subr.mxu0 %v2003_v2 }
 0x1a8   : > { %v1015_v24 = vpop.permute.xlu1 %1014  ;;  %v1200_v25 = vpop.permute.xlu0 %1199 }
 0x1a9   : > { %1769 = vmatpush3.xpose.msk.msra.mxu1 %vm648_vm3, %v820_v8  ;;  %1790 = vmatpush3.xpose.msk.msra.mxu0 %vm648_vm3, %v1015_v24 }
 0x1aa   : > { %1770 = vmatprep.subr.mxu1 %v2003_v2  ;;  %1791 = vmatprep.subr.mxu0 %v2003_v2 }
 0x1ac   : > { %v1013_v26 = vpop.permute.xlu1 %1012  ;;  %v1198_v28 = vpop.permute.xlu0 %1197 }
 0x1ad   : > { %1771 = vmatpush3.xpose.msk.msra.mxu1 %vm648_vm3, %v818_v13  ;;  %1792 = vmatpush3.xpose.msk.msra.mxu0 %vm648_vm3, %v1013_v26 }
 0x1ae   : > { %1772 = vmatprep.subr.mxu1 %v2003_v2  ;;  %1793 = vmatprep.subr.mxu0 %v2003_v2 }
 0x1b0   : > { %v1011_v27 = vpop.permute.xlu1 %1010  ;;  %v1196_v30 = vpop.permute.xlu0 %1195 }
 0x1b1   : > { %1773 = vmatpush3.xpose.msk.msra.mxu1 %vm648_vm3, %v816_v10  ;;  %1794 = vmatpush3.xpose.msk.msra.mxu0 %vm648_vm3, %v1011_v27 }
 0x1b2   : > { %1812 = vmatprep.subr.mxu1 %v2003_v2  ;;  %1795 = vmatprep.subr.mxu0 %v2003_v2 }
 0x1b4   : > { %v1009_v29 = vpop.permute.xlu1 %1008  ;;  %1775 = vmatmul.mubr.msk.f32.vlgmr.msra.gmra.mxu1 %vm648_vm3, %v798_v15 }
 0x1b5   : > { %1796 = vmatpush3.xpose.msk.msra.mxu0 %vm648_vm3, %v1009_v29  ;;  %1813 = vmatpush3.xpose.msk.msra.mxu1 %vm648_vm3, %v1208_v17  ;;  %v1194_v33 = vpop.permute.xlu0 %1193 }
 0x1b6   : > { %1814 = vmatprep.subr.mxu1 %v2003_v2  ;;  %1797 = vmatprep.subr.mxu0 %v2003_v2 }
 0x1b7   : > { %1844 = vmatprep.mubr.msk.f32.mxu1 %vm2004_vm1, %v2003_v2 }
 0x1b8   : > { %v1007_v31 = vpop.permute.xlu1 %1006 }
 0x1b9   : > { %1798 = vmatpush3.xpose.msk.msra.mxu0 %vm648_vm3, %v1007_v31  ;;  %1815 = vmatpush3.xpose.msk.msra.mxu1 %vm648_vm3, %v1206_v19  ;;  %v1192_v35 = vpop.permute.xlu0 %1191 }
 0x1ba   : > { %1816 = vmatprep.subr.mxu1 %v2003_v2  ;;  %1799 = vmatprep.subr.mxu0 %v2003_v2 }
 0x1bc   : > { %v1005_v32 = vpop.permute.xlu1 %1004 }
 0x1bd   : > { %1800 = vmatpush3.xpose.msk.msra.mxu0 %vm648_vm3, %v1005_v32  ;;  %1817 = vmatpush3.xpose.msk.msra.mxu1 %vm648_vm3, %v1204_v21  ;;  %v1190_v38 = vpop.permute.xlu0 %1189 }
 0x1be   : > { %1818 = vmatprep.subr.mxu1 %v2003_v2  ;;  %1801 = vmatprep.subr.mxu0 %v2003_v2 }
 0x1c0   : > { %v1003_v34 = vpop.permute.xlu1 %1002 }
 0x1c1   : > { %1802 = vmatpush3.xpose.msk.msra.mxu0 %vm648_vm3, %v1003_v34  ;;  %1819 = vmatpush3.xpose.msk.msra.mxu1 %vm648_vm3, %v1202_v23  ;;  %v1188_v40 = vpop.permute.xlu0 %1187 }
 0x1c2   : > { %1820 = vmatprep.subr.mxu1 %v2003_v2  ;;  %1803 = vmatprep.subr.mxu0 %v2003_v2 }
 0x1c4   : > { %v1001_v36 = vpop.permute.xlu1 %1000 }
 0x1c5   : > { %1804 = vmatpush3.xpose.msk.msra.mxu0 %vm648_vm3, %v1001_v36  ;;  %1821 = vmatpush3.xpose.msk.msra.mxu1 %vm648_vm3, %v1200_v25  ;;  %v1186_v42 = vpop.permute.xlu0 %1185 }
 0x1c6   : > { %1822 = vmatprep.subr.mxu1 %v2003_v2  ;;  %1805 = vmatprep.subr.mxu0 %v2003_v2 }
 0x1c8   : > { %v999_v37 = vpop.permute.xlu1 %998 }
 0x1c9   : > { %1806 = vmatpush3.xpose.msk.msra.mxu0 %vm648_vm3, %v999_v37  ;;  %1823 = vmatpush3.xpose.msk.msra.mxu1 %vm648_vm3, %v1198_v28  ;;  %v1184_v43 = vpop.permute.xlu0 %1183 }
 0x1ca   : > { %1824 = vmatprep.subr.mxu1 %v2003_v2  ;;  %1807 = vmatprep.subr.mxu0 %v2003_v2 }
 0x1cc   : > { %v997_v39 = vpop.permute.xlu1 %996 }
 0x1cd   : > { %1808 = vmatpush3.xpose.msk.msra.mxu0 %vm648_vm3, %v997_v39  ;;  %1825 = vmatpush3.xpose.msk.msra.mxu1 %vm648_vm3, %v1196_v30  ;;  %v1182_v44 = vpop.permute.xlu0 %1181 }
 0x1ce   : > { %1826 = vmatprep.subr.mxu1 %v2003_v2 }
 0x1d0   : > { %v979_v41 = vpop.permute.xlu1 %978 }
 0x1d1   : > { %1810 = vmatmul.mubr.msk.f32.vlgmr.msra.gmra.mxu0 %vm648_vm3, %v979_v41  ;;  %1827 = vmatpush3.xpose.msk.msra.mxu1 %vm648_vm3, %v1194_v33  ;;  %v1180_v45 = vpop.permute.xlu0 %1179 }
 0x1d2   : > { %1828 = vmatprep.subr.mxu1 %v2003_v2 }
 0x1d5   : > { %1829 = vmatpush3.xpose.msk.msra.mxu1 %vm648_vm3, %v1192_v35  ;;  %v1178_v46 = vpop.permute.xlu0 %1177 }
 0x1d6   : > { %1830 = vmatprep.subr.mxu1 %v2003_v2 }
 0x1d9   : > { %1831 = vmatpush3.xpose.msk.msra.mxu1 %vm648_vm3, %v1190_v38  ;;  %v1160_v47 = vpop.permute.xlu0 %1159 }
 0x1da   : > { %1832 = vmatprep.subr.mxu1 %v2003_v2 }
 0x1dd   : > { %1833 = vmatpush3.xpose.msk.msra.mxu1 %vm648_vm3, %v1188_v40 }
 0x1de   : > { %1834 = vmatprep.subr.mxu1 %v2003_v2 }
 0x1e1   : > { %1835 = vmatpush3.xpose.msk.msra.mxu1 %vm648_vm3, %v1186_v42 }
 0x1e2   : > { %1836 = vmatprep.subr.mxu1 %v2003_v2 }
 0x1e5   : > { %1837 = vmatpush3.xpose.msk.msra.mxu1 %vm648_vm3, %v1184_v43 }
 0x1e6   : > { %1838 = vmatprep.subr.mxu1 %v2003_v2 }
 0x1e9   : > { %1839 = vmatpush3.xpose.msk.msra.mxu1 %vm648_vm3, %v1182_v44 }
 0x1ea   : > { %1840 = vmatprep.subr.mxu1 %v2003_v2 }
 0x1ed   : > { %1841 = vmatpush3.xpose.msk.msra.mxu1 %vm648_vm3, %v1180_v45 }
 0x1ee   : > { %1842 = vmatprep.subr.mxu1 %v2003_v2 }
 0x1f1   : > { %1843 = vmatpush3.xpose.msk.msra.mxu1 %vm648_vm3, %v1178_v46 }
 0x1f4   : > { %1845 = vmatmul.mubr.msk.f32.vlgmr.msra.gmra.mxu1 %vm648_vm3, %v1160_v47 }
 0x202   : > { %v766_v49 = vpop.f32.mrf.mxu0 }
 0x203   : > { %v767_v50 = vadd.f32 %v766_v49, %v631_v48 }
 0x204   : > { %v1741_v51 = vpop.f32.mrf.mxu0 }
 0x205   : > { %770 = vmax.xlane.f32.xlu1 %v767_v50 }
 0x274   : > { %v947_v52 = vpop.f32.mrf.mxu1 }
 0x275   : > { %v948_v53 = vadd.f32 %v947_v52, %v631_v48 }
 0x276   : > { %v1776_v54 = vpop.f32.mrf.mxu1 }
 0x277   : > { %951 = vmax.xlane.f32.xlu0 %v948_v53 }
 0x28e   : > { %v771_v55 = vpop.xlane.xlu1 %770 }
 0x28f   : > { %v772_v56 = vsub.f32 %v767_v50, %v771_v55 }
 0x291   : > { %v773_v2 = vmul.f32 1.442695, %v772_v56  ;;  %v1128_v57 = vpop.f32.mrf.mxu0 }
 0x292   : > { %v1129_v58 = vadd.f32 %v1128_v57, %v631_v48 }
 0x293   : > { %1909 = vpow2.f32 %v773_v2  ;;  %v1811_v59 = vpop.f32.mrf.mxu0 }
 0x294   : > { %1132 = vmax.xlane.f32.xlu0 %v1129_v58 }
 0x2a0   : > { %v1910_v60 = vpop.eup %1909 }
 0x2a1   : > { %775 = vadd.xlane.f32.xlu0 %v1910_v60 }
 0x2b4   : > { %v1309_v61 = vpop.f32.mrf.mxu1 }
 0x2b5   : > { %v1310_v62 = vadd.f32 %v1309_v61, %v631_v48 }
 0x2b6   : > { %v1846_v63 = vpop.f32.mrf.mxu1 }
 0x2b7   : > { %1313 = vmax.xlane.f32.xlu1 %v1310_v62 }
 0x300   : > { %v952_v0 = vpop.xlane.xlu0 %951 }
 0x301   : > { %v953_v1 = vsub.f32 %v948_v53, %v952_v0 }
 0x303   : > { %v954_v3 = vmul.f32 1.442695, %v953_v1 }
 0x305   : > { %1911 = vpow2.f32 %v954_v3 }
 0x312   : > { %v1912_v4 = vpop.eup %1911 }
 0x313   : > { %956 = vadd.xlane.f32.xlu1 %v1912_v4 }
 0x31d   : > { %v1133_v5 = vpop.xlane.xlu0 %1132 }
 0x31e   : > { %v1134_v6 = vsub.f32 %v1129_v58, %v1133_v5 }
 0x320   : > { %v1135_v7 = vmul.f32 1.442695, %v1134_v6 }
 0x322   : > { %1913 = vpow2.f32 %v1135_v7 }
 0x32a   : > { %v776_v8 = vpop.xlane.xlu0 %775 }
 0x32b   : > { %1915 = vrcp.f32 %v776_v8 }
 0x32f   : > { %v1914_v9 = vpop.eup %1913 }
 0x330   : > { %1137 = vadd.xlane.f32.xlu0 %v1914_v9 }
 0x338   : > { %v1916_v10 = vpop.eup %1915 }
 0x339   : > { %v778_v11 = vmul.f32 %v1916_v10, %v1910_v60 }
 0x33b   : > { %780 = vst.msk [vmem:[%s291_s9] sm:$0xff] %vm779_vm4, %v778_v11 }
 0x340   : > { %v1314_v12 = vpop.xlane.xlu1 %1313 }
 0x341   : > { %v1315_v13 = vsub.f32 %v1310_v62, %v1314_v12 }
 0x343   : > { %v1316_v14 = vmul.f32 1.442695, %v1315_v13 }
 0x345   : > { %1917 = vpow2.f32 %v1316_v14 }
 0x352   : > { %v1918_v15 = vpop.eup %1917 }
 0x353   : > { %1318 = vadd.xlane.f32.xlu1 %v1918_v15 }
 0x39c   : > { %v957_v16 = vpop.xlane.xlu1 %956 }
 0x39d   : > { %1919 = vrcp.f32 %v957_v16 }
 0x3aa   : > { %v1920_v17 = vpop.eup %1919 }
 0x3ab   : > { %v959_v18 = vmul.f32 %v1920_v17, %v1912_v4 }
 0x3ad   : > { %1527 = vst.msk [vmem:[%s291_s9 + $0x8] sm:$0xff] %vm779_vm4, %v959_v18 }
 0x3b9   : > { %v1138_v19 = vpop.xlane.xlu0 %1137 }
 0x3ba   : > { %1921 = vrcp.f32 %v1138_v19 }
 0x3c7   : > { %v1922_v20 = vpop.eup %1921 }
 0x3c8   : > { %v1140_v21 = vmul.f32 %v1922_v20, %v1914_v9 }
 0x3ca   : > { %1545 = vst.msk [vmem:[%s291_s9 + $0x10] sm:$0xff] %vm779_vm4, %v1140_v21 }
 0x3dc   : > { %v1319_v22 = vpop.xlane.xlu1 %1318 }
 0x3dd   : > { %1923 = vrcp.f32 %v1319_v22 }
 0x3ea   : > { %v1924_v23 = vpop.eup %1923 }
 0x3eb   : > { %v1321_v24 = vmul.f32 %v1924_v23, %v1918_v15 }
 0x3ed   : > { %1563 = vst.msk [vmem:[%s291_s9 + $0x18] sm:$0xff] %vm779_vm4, %v1321_v24 }
 0x3ee   : > { %1938 = shalt.err (!%p1935_p5)
}
 0x3ef   : > { %s1939_s25 = scalar_lea.hbm %s2437_s14, 512  ;;  %s1943_s7 = scalar_lea.hbm %s2494_s5, 1024 }
 0x3f0   : > { %p1940_p6 = scmp.ne.s32.totalorder %s2437_s14, %s1939_s25  ;;  %p1944_p10 = scmp.lt.s32.totalorder %s2437_s14, %s2494_s5 }
 0x3f1   : > { %p1945_p11 = scmp.lt.s32.totalorder %s1943_s7, %s1939_s25 }
 0x3f2   : > { %p1941_p7 = pnand %p1940_p6, %p2081_p4 }
 0x3f3   : > { %p1946_p12 = por %p1945_p11, %p1944_p10 }
 0x3f4   : > { %p1942_p9 = pneg %p1941_p7 }
 0x3f6   : > { %p1947_p13 = pnand %p1946_p12, %p1942_p9 }
 0x3f8   : > { %1950 = shalt.err (!%p1947_p13)
}
 0x3f9   : > { %s2009_s10 = smov 128   ;;  %s2010_s12 = smov 8  }
 0x3fa   : > { %1847 = dma.vmem_to_hbm [thread:$0]  (%p2081_p4), %s2439_s11, 512, %s2437_s14, %s2444_s15, %s2009_s10, %s2009_s10, %s2010_s12  }
 0x3fb PF: > { %p1853_p0 = scmp.ge.s32.totalorder %s2001_s23, 2  ;;  %s1356_s13 = sand.u32 1, %s1981_s18  }
 0x3fc   : > { %s1357_s16 = scalar_lea.sflag [#allocation4], %s1356_s13 }
 0x3fd   : > { %p1850_p1 = pnand %p1853_p0, %p2088_p8 }
 0x3ff   : > { %p1851_p2 = pneg %p1850_p1 }
 0x401   : > { %1976 = dma.done.wait (%p1851_p2), %s1357_s16, 512  }
 0x402   : > { %1978 = vsyncadd (%p1851_p2), %s1357_s16, 4294966784  ;;  %s18_s23 = sadd.s32 1, %s2001_s23   ;;  %s2497_s18 = smov %s1985_s19 }
 0x403   : > { %p15_p3 = scmp.ge.s32.totalorder %s18_s23, 4   ;;  %s2498_s19 = smov %s1989_s20 }
 0x404   : > { %s2499_s20 = smov %s2094_s6  ;;  %s2500_s21 = smov %s1997_s22 }
 0x405   : > { %s2501_s22 = smov %s2503_s26  ;;  %17 = sbr.rel (!%p15_p3) target bundleno = 4 (0x4), region = 92 }
 0x40a   :  { %1362 = vsyncpa [#allocation4], 1 }
 0x40b   :  { %1364 = vsyncpa [#allocation4 + $0x1], 1 }

</bundles_post_ra>
